<compile_context>
chip_gen: v5e
topology: v5e:2x2
jax: 0.10.0
libtpu: 0.0.40
codegen_flags: <defaults>
</compile_context>

<pallas_src>
from functools import partial

import jax
import jax.numpy as jnp
from jax.experimental import pallas as pl
from jax.experimental.pallas import tpu as pltpu


def _round_up(x, m):
    return (x + m - 1) // m * m


@partial(jax.jit, static_argnames=("eps", "stride", "padding", "dilation", "use_bf16_matmul"))
def conv_bn_relu(x, w, gamma, beta, eps=1e-5, stride=1, padding=1, dilation=1,
                 use_bf16_matmul=False):
    """Forward of ConvBnReLU. x: (N, C_in, H, W) f32, w: (C_out, C_in, KH, KW) f32."""
    N, C_in, H, W = x.shape
    C_out, _, KH, KW = w.shape
    H_out = (H + 2 * padding - dilation * (KH - 1) - 1) // stride + 1
    W_out = (W + 2 * padding - dilation * (KW - 1) - 1) // stride + 1
    HW = H_out * W_out
    NHW = N * HW
    K = KH * KW * C_in

    # ---- wrapper glue: im2col with the batch folded onto the lane axis -> (K, N*HW).
    # TODO(synk): for production H,W,C drop this HBM-materialized 9x slab and instead DMA one
    # padded x tile (with halo) per (n, spatial-tile) inside the kernel, feeding the MXU with
    # 9 shifted sub-views as accumulating dots; at real sizes that slab's HBM traffic (not the
    # MXU) is the bottleneck.
    x_pad = jnp.pad(x, ((0, 0), (0, 0), (padding, padding), (padding, padding)))
    taps = []
    for kh in range(KH):
        for kw in range(KW):
            h0 = kh * dilation
            w0 = kw * dilation
            taps.append(
                x_pad[:, :,
                      h0:h0 + stride * (H_out - 1) + 1:stride,
                      w0:w0 + stride * (W_out - 1) + 1:stride])          # (N, C_in, H_out, W_out)
    patches = jnp.stack(taps, axis=1).reshape(N, K, HW)                   # K ordered (kh, kw, cin)
    patches = jnp.transpose(patches, (1, 0, 2)).reshape(K, NHW)           # batch folded onto lanes
    w_flat = jnp.transpose(w, (0, 2, 3, 1)).reshape(C_out, K)             # matches tap ordering

    # bf16 MXU feed (f32 accumulate) is valid on v5e/v6e/v7x (all MXUs are bf16-native; only
    # v5e's VPU/EUP lack bf16, which this path never uses).  Cast hoisted out of the kernel so
    # it is not re-executed per grid step and the patch slab's HBM read / VMEM buffer halves.
    feed_dtype = jnp.bfloat16 if use_bf16_matmul else x.dtype
    patches = patches.astype(feed_dtype)
    w_flat = w_flat.astype(feed_dtype)

    # ---- lane tiling: pad N*HW up to a 128 multiple (unmasked 128-lane stores for any H,W);
    # padded columns are zero so they contribute nothing to sum/sumsq and are excluded via the
    # real-element count below.  Tile size keeps double-buffered tiles well inside every
    # generation's VMEM (v7x has only 64 MiB physical / 32 MiB default scoped).
    itemsize = jnp.dtype(feed_dtype).itemsize
    lane_budget_bytes = 8 << 20
    lanes_cap = max(128, (lane_budget_bytes // (2 * (K * itemsize + 2 * C_out * 4)) // 128) * 128)
    L_TILE = min(_round_up(NHW, 128), lanes_cap)
    L_total = _round_up(NHW, L_TILE)
    num_tiles = L_total // L_TILE
    patches = jnp.pad(patches, ((0, 0), (0, L_total - NHW)))

    # ---------------- kernel 1: conv as one MXU dot per lane tile + per-tile stats ------------
    def conv_stats_kernel(p_ref, w_ref, y_ref, ssum_ref, ssq_ref):
        acc = jnp.dot(w_ref[...], p_ref[...], preferred_element_type=jnp.float32)  # (C_out, L)
        y_ref[...] = acc                                    # unmasked 128-lane stores
        ssum_ref[0] = jnp.sum(acc, axis=1, keepdims=True)   # (C_out, 1) partial (XLU slot)
        ssq_ref[0] = jnp.sum(acc * acc, axis=1, keepdims=True)

    conv_flat, ssum, ssq = pl.pallas_call(
        conv_stats_kernel,
        grid=(num_tiles,),
        in_specs=[
            pl.BlockSpec((K, L_TILE), lambda t: (0, t)),
            pl.BlockSpec((C_out, K), lambda t: (0, 0)),
        ],
        out_specs=(
            pl.BlockSpec((C_out, L_TILE), lambda t: (0, t)),
            pl.BlockSpec((1, C_out, 1), lambda t: (t, 0, 0)),
            pl.BlockSpec((1, C_out, 1), lambda t: (t, 0, 0)),
        ),
        out_shape=(
            jax.ShapeDtypeStruct((C_out, L_total), jnp.float32),
            jax.ShapeDtypeStruct((num_tiles, C_out, 1), jnp.float32),
            jax.ShapeDtypeStruct((num_tiles, C_out, 1), jnp.float32),
        ),
        # lane-tile axis is independent per step (per-tile partial stats, disjoint y slices)
        compiler_params=pltpu.CompilerParams(
            dimension_semantics=("parallel",),
            vmem_limit_bytes=32 * 1024 * 1024),
    )(patches, w_flat)

    # ---------------- kernel 2: BN (training-mode batch stats) + ReLU, in place ---------------
    inv_count = 1.0 / float(NHW)                            # real elements only (exclude padding)
    gamma2 = gamma.reshape(C_out, 1).astype(jnp.float32)
    beta2 = beta.reshape(C_out, 1).astype(jnp.float32)

    # purely HBM-bandwidth bound: use the largest lane block that fits the budget (the whole
    # slab at small/medium sizes), otherwise fall back to the kernel-1 tile (which divides it).
    L2_TILE = L_total if (4 * C_out * L_total * 4) <= lane_budget_bytes else L_TILE
    num_tiles2 = L_total // L2_TILE

    def bn_relu_kernel(y_ref, ssum_ref, ssq_ref, g_ref, b_ref, o_ref):
        # inter-kernel math folded in here: tiny (C_out)-sized reduction + rsqrt (EUP slot).
        s_tot = jnp.sum(ssum_ref[...], axis=0)                          # (C_out, 1)
        sq_tot = jnp.sum(ssq_ref[...], axis=0)
        mean = s_tot * inv_count
        var = jnp.maximum(sq_tot * inv_count - mean * mean, 0.0)        # clamp cancellation
        scale = g_ref[...] * jax.lax.rsqrt(var + eps)
        bias = b_ref[...] - mean * scale
        o_ref[...] = jnp.maximum(y_ref[...] * scale + bias, 0.0).astype(o_ref.dtype)

    out_flat = pl.pallas_call(
        bn_relu_kernel,
        grid=(num_tiles2,),
        in_specs=[
            pl.BlockSpec((C_out, L2_TILE), lambda t: (0, t)),
            pl.BlockSpec((num_tiles, C_out, 1), lambda t: (0, 0, 0)),
            pl.BlockSpec((num_tiles, C_out, 1), lambda t: (0, 0, 0)),
            pl.BlockSpec((C_out, 1), lambda t: (0, 0)),
            pl.BlockSpec((C_out, 1), lambda t: (0, 0)),
        ],
        out_specs=pl.BlockSpec((C_out, L2_TILE), lambda t: (0, t)),
        out_shape=jax.ShapeDtypeStruct((C_out, L_total), jnp.float32),
        input_output_aliases={0: 0},                        # reuse conv_flat's HBM buffer
        compiler_params=pltpu.CompilerParams(
            dimension_semantics=("parallel",),
            vmem_limit_bytes=32 * 1024 * 1024),
    )(conv_flat, ssum, ssq, gamma2, beta2)

    # drop the zero-padded lanes and restore NCHW
    out = out_flat[:, :NHW].reshape(C_out, N, H_out, W_out)
    return jnp.transpose(out, (1, 0, 2, 3))

    # TODO(synk): BatchNorm's running_mean/running_var momentum update is a training-time side
    # effect and is not part of the forward output; it is intentionally not emitted here.


if __name__ == "__main__":
    key = jax.random.PRNGKey(0)
    k1, k2, k3, k4 = jax.random.split(key, 4)

    N, C_in, C_out, H, W = 2, 4, 8, 16, 16
    x = jax.random.normal(k1, (N, C_in, H, W), jnp.float32)
    # deterministic synthetic parameters (shapes match nn.Conv2d(4, 8, 3) / nn.BatchNorm2d(8))
    w = jax.random.normal(k2, (C_out, C_in, 3, 3), jnp.float32) / jnp.sqrt(C_in * 3 * 3)
    gamma = 1.0 + 0.1 * jax.random.normal(k3, (C_out,), jnp.float32)
    beta = 0.1 * jax.random.normal(k4, (C_out,), jnp.float32)

    out = conv_bn_relu(x, w, gamma, beta)
    out = jax.block_until_ready(out)

    # pure-JAX reference (conv -> training-mode BN -> ReLU)
    ref_conv = jax.lax.conv_general_dilated(
        x, w, window_strides=(1, 1), padding=((1, 1), (1, 1)),
        dimension_numbers=("NCHW", "OIHW", "NCHW"))
    mean = ref_conv.mean(axis=(0, 2, 3))
    var = ref_conv.var(axis=(0, 2, 3))  # biased, as BatchNorm uses for normalization
    ref = jnp.maximum(
        (ref_conv - mean[None, :, None, None]) / jnp.sqrt(var + 1e-5)[None, :, None, None]
        * gamma[None, :, None, None] + beta[None, :, None, None], 0.0)

    assert out.shape == (N, C_out, H, W)
    assert jnp.allclose(out, ref, atol=1e-4, rtol=1e-4), float(jnp.max(jnp.abs(out - ref)))
    print("KERNEL_OK")
</pallas_src>

<mosaic_0001>
module attributes {stable_mosaic.version = 11 : i64} {
  func.func @conv_stats_kernel(%arg0: i32, %arg1: memref<36x512xf32, #tpu.memory_space<vmem>>, %arg2: memref<8x36xf32, #tpu.memory_space<vmem>>, %arg3: memref<8x512xf32, #tpu.memory_space<vmem>>, %arg4: memref<1x8x1xf32, #tpu.memory_space<vmem>>, %arg5: memref<1x8x1xf32, #tpu.memory_space<vmem>>) attributes {dimension_semantics = [#tpu.dimension_semantics<parallel>], iteration_bounds = array<i64: 1>, scalar_prefetch = 0 : i64, scratch_operands = 0 : i64, tpu.core_type = #tpu.core_type<tc>, window_params = [{transform_indices = @transform_0, window_bounds = array<i64: 36, 512>}, {pipeline_mode = #tpu.pipeline_mode<synchronous>, transform_indices = @transform_1, window_bounds = array<i64: 8, 36>}, {transform_indices = @transform_2, window_bounds = array<i64: 8, 512>}, {transform_indices = @transform_3, window_bounds = array<i64: 1, 8, 1>}, {transform_indices = @transform_4, window_bounds = array<i64: 1, 8, 1>}]} {
    %c0 = arith.constant 0 : index
    %c0_0 = arith.constant 0 : index
    %0 = vector.load %arg2[%c0, %c0_0] : memref<8x36xf32, #tpu.memory_space<vmem>>, vector<8x36xf32>
    %c0_1 = arith.constant 0 : index
    %c0_2 = arith.constant 0 : index
    %1 = vector.load %arg1[%c0_1, %c0_2] : memref<36x512xf32, #tpu.memory_space<vmem>>, vector<36x512xf32>
    %cst = arith.constant dense<0.000000e+00> : vector<8x512xf32>
    %2 = tpu.matmul %0, %1, %cst {dimension_numbers = #tpu.dot_dimension_numbers<[1], [0], [0], [1], [0, 0, 1, 1], [], []>} : vector<8x36xf32>, vector<36x512xf32>, vector<8x512xf32> -> vector<8x512xf32>
    %c0_3 = arith.constant 0 : index
    %c0_4 = arith.constant 0 : index
    %3 = vector.load %arg3[%c0_3, %c0_4] : memref<8x512xf32, #tpu.memory_space<vmem>>, vector<8x512xf32>
    tpu.vector_store %arg3[%c0_3, %c0_4], %2 {strides = array<i32>} : memref<8x512xf32, #tpu.memory_space<vmem>>, vector<8x512xf32>,
    %cst_5 = arith.constant dense<0.000000e+00> : vector<8xf32>
    %4 = vector.multi_reduction <add>, %2, %cst_5 [1] : vector<8x512xf32> to vector<8xf32>
    %5 = vector.shape_cast %4 : vector<8xf32> to vector<8x1xf32>
    %c0_6 = arith.constant 0 : index
    %c0_7 = arith.constant 0 : index
    %c0_8 = arith.constant 0 : index
    %6 = vector.load %arg4[%c0_6, %c0_7, %c0_8] : memref<1x8x1xf32, #tpu.memory_space<vmem>>, vector<1x8x1xf32>
    %7 = vector.shape_cast %6 : vector<1x8x1xf32> to vector<8x1xf32>
    %8 = vector.shape_cast %5 : vector<8x1xf32> to vector<1x8x1xf32>
    tpu.vector_store %arg4[%c0_6, %c0_7, %c0_8], %8 {strides = array<i32>} : memref<1x8x1xf32, #tpu.memory_space<vmem>>, vector<1x8x1xf32>,
    %9 = arith.mulf %2, %2 : vector<8x512xf32>
    %cst_9 = arith.constant dense<0.000000e+00> : vector<8xf32>
    %10 = vector.multi_reduction <add>, %9, %cst_9 [1] : vector<8x512xf32> to vector<8xf32>
    %11 = vector.shape_cast %10 : vector<8xf32> to vector<8x1xf32>
    %c0_10 = arith.constant 0 : index
    %c0_11 = arith.constant 0 : index
    %c0_12 = arith.constant 0 : index
    %12 = vector.load %arg5[%c0_10, %c0_11, %c0_12] : memref<1x8x1xf32, #tpu.memory_space<vmem>>, vector<1x8x1xf32>
    %13 = vector.shape_cast %12 : vector<1x8x1xf32> to vector<8x1xf32>
    %14 = vector.shape_cast %11 : vector<8x1xf32> to vector<1x8x1xf32>
    tpu.vector_store %arg5[%c0_10, %c0_11, %c0_12], %14 {strides = array<i32>} : memref<1x8x1xf32, #tpu.memory_space<vmem>>, vector<1x8x1xf32>,
    return
  }
  func.func @transform_0(%arg0: i32) -> (i32, i32) {
    %c0_i32 = arith.constant 0 : i32
    %c0_i32_0 = arith.constant 0 : i32
    return %c0_i32, %arg0 : i32, i32
  }
  func.func @transform_1(%arg0: i32) -> (i32, i32) {
    %c0_i32 = arith.constant 0 : i32
    %c0_i32_0 = arith.constant 0 : i32
    %c0_i32_1 = arith.constant 0 : i32
    return %c0_i32, %c0_i32_0 : i32, i32
  }
  func.func @transform_2(%arg0: i32) -> (i32, i32) {
    %c0_i32 = arith.constant 0 : i32
    %c0_i32_0 = arith.constant 0 : i32
    return %c0_i32, %arg0 : i32, i32
  }
  func.func @transform_3(%arg0: i32) -> (i32, i32, i32) {
    %c0_i32 = arith.constant 0 : i32
    %c0_i32_0 = arith.constant 0 : i32
    %c0_i32_1 = arith.constant 0 : i32
    return %arg0, %c0_i32, %c0_i32_0 : i32, i32, i32
  }
  func.func @transform_4(%arg0: i32) -> (i32, i32, i32) {
    %c0_i32 = arith.constant 0 : i32
    %c0_i32_0 = arith.constant 0 : i32
    %c0_i32_1 = arith.constant 0 : i32
    return %arg0, %c0_i32, %c0_i32_0 : i32, i32, i32
  }
}

module attributes {stable_mosaic.version = 11 : i64} {
  func.func @bn_relu_kernel(%arg0: i32, %arg1: memref<8x512xf32, #tpu.memory_space<vmem>>, %arg2: memref<1x8x1xf32, #tpu.memory_space<vmem>>, %arg3: memref<1x8x1xf32, #tpu.memory_space<vmem>>, %arg4: memref<8x1xf32, #tpu.memory_space<vmem>>, %arg5: memref<8x1xf32, #tpu.memory_space<vmem>>, %arg6: memref<8x512xf32, #tpu.memory_space<vmem>>) attributes {dimension_semantics = [#tpu.dimension_semantics<parallel>], iteration_bounds = array<i64: 1>, scalar_prefetch = 0 : i64, scratch_operands = 0 : i64, tpu.core_type = #tpu.core_type<tc>, window_params = [{transform_indices = @transform_0, window_bounds = array<i64: 8, 512>}, {pipeline_mode = #tpu.pipeline_mode<synchronous>, transform_indices = @transform_1, window_bounds = array<i64: 1, 8, 1>}, {pipeline_mode = #tpu.pipeline_mode<synchronous>, transform_indices = @transform_2, window_bounds = array<i64: 1, 8, 1>}, {pipeline_mode = #tpu.pipeline_mode<synchronous>, transform_indices = @transform_3, window_bounds = array<i64: 8, 1>}, {pipeline_mode = #tpu.pipeline_mode<synchronous>, transform_indices = @transform_4, window_bounds = array<i64: 8, 1>}, {transform_indices = @transform_5, window_bounds = array<i64: 8, 512>}]} {
    %c0 = arith.constant 0 : index
    %c0_0 = arith.constant 0 : index
    %c0_1 = arith.constant 0 : index
    %0 = vector.load %arg2[%c0, %c0_0, %c0_1] : memref<1x8x1xf32, #tpu.memory_space<vmem>>, vector<1x8x1xf32>
    %cst = arith.constant dense<0.000000e+00> : vector<8x1xf32>
    %1 = vector.multi_reduction <add>, %0, %cst [0] : vector<1x8x1xf32> to vector<8x1xf32>
    %c0_2 = arith.constant 0 : index
    %c0_3 = arith.constant 0 : index
    %c0_4 = arith.constant 0 : index
    %2 = vector.load %arg3[%c0_2, %c0_3, %c0_4] : memref<1x8x1xf32, #tpu.memory_space<vmem>>, vector<1x8x1xf32>
    %cst_5 = arith.constant dense<0.000000e+00> : vector<8x1xf32>
    %3 = vector.multi_reduction <add>, %2, %cst_5 [0] : vector<1x8x1xf32> to vector<8x1xf32>
    %cst_6 = arith.constant 0.001953125 : f32
    %4 = vector.broadcast %cst_6 : f32 to vector<8x1xf32>
    %5 = arith.mulf %1, %4 : vector<8x1xf32>
    %cst_7 = arith.constant 0.001953125 : f32
    %6 = vector.broadcast %cst_7 : f32 to vector<8x1xf32>
    %7 = arith.mulf %3, %6 : vector<8x1xf32>
    %8 = arith.mulf %5, %5 : vector<8x1xf32>
    %9 = arith.subf %7, %8 : vector<8x1xf32>
    %cst_8 = arith.constant 0.000000e+00 : f32
    %10 = vector.broadcast %cst_8 : f32 to vector<8x1xf32>
    %11 = arith.maximumf %9, %10 : vector<8x1xf32>
    %c0_9 = arith.constant 0 : index
    %c0_10 = arith.constant 0 : index
    %12 = vector.load %arg4[%c0_9, %c0_10] : memref<8x1xf32, #tpu.memory_space<vmem>>, vector<8x1xf32>
    %cst_11 = arith.constant 9.99999974E-6 : f32
    %13 = vector.broadcast %cst_11 : f32 to vector<8x1xf32>
    %14 = arith.addf %11, %13 : vector<8x1xf32>
    %15 = math.rsqrt %14 : vector<8x1xf32>
    %16 = arith.mulf %12, %15 : vector<8x1xf32>
    %c0_12 = arith.constant 0 : index
    %c0_13 = arith.constant 0 : index
    %17 = vector.load %arg5[%c0_12, %c0_13] : memref<8x1xf32, #tpu.memory_space<vmem>>, vector<8x1xf32>
    %18 = arith.mulf %5, %16 : vector<8x1xf32>
    %19 = arith.subf %17, %18 : vector<8x1xf32>
    %c0_14 = arith.constant 0 : index
    %c0_15 = arith.constant 0 : index
    %20 = vector.load %arg1[%c0_14, %c0_15] : memref<8x512xf32, #tpu.memory_space<vmem>>, vector<8x512xf32>
    %21 = vector.broadcast %16 : vector<8x1xf32> to vector<8x512xf32>
    %22 = arith.mulf %20, %21 : vector<8x512xf32>
    %23 = vector.broadcast %19 : vector<8x1xf32> to vector<8x512xf32>
    %24 = arith.addf %22, %23 : vector<8x512xf32>
    %cst_16 = arith.constant 0.000000e+00 : f32
    %25 = vector.broadcast %cst_16 : f32 to vector<8x512xf32>
    %26 = arith.maximumf %24, %25 : vector<8x512xf32>
    %c0_17 = arith.constant 0 : index
    %c0_18 = arith.constant 0 : index
    %27 = vector.load %arg6[%c0_17, %c0_18] : memref<8x512xf32, #tpu.memory_space<vmem>>, vector<8x512xf32>
    tpu.vector_store %arg6[%c0_17, %c0_18], %26 {strides = array<i32>} : memref<8x512xf32, #tpu.memory_space<vmem>>, vector<8x512xf32>,
    return
  }
  func.func @transform_0(%arg0: i32) -> (i32, i32) {
    %c0_i32 = arith.constant 0 : i32
    %c0_i32_0 = arith.constant 0 : i32
    return %c0_i32, %arg0 : i32, i32
  }
  func.func @transform_1(%arg0: i32) -> (i32, i32, i32) {
    %c0_i32 = arith.constant 0 : i32
    %c0_i32_0 = arith.constant 0 : i32
    %c0_i32_1 = arith.constant 0 : i32
    %c0_i32_2 = arith.constant 0 : i32
    return %c0_i32, %c0_i32_0, %c0_i32_1 : i32, i32, i32
  }
  func.func @transform_2(%arg0: i32) -> (i32, i32, i32) {
    %c0_i32 = arith.constant 0 : i32
    %c0_i32_0 = arith.constant 0 : i32
    %c0_i32_1 = arith.constant 0 : i32
    %c0_i32_2 = arith.constant 0 : i32
    return %c0_i32, %c0_i32_0, %c0_i32_1 : i32, i32, i32
  }
  func.func @transform_3(%arg0: i32) -> (i32, i32) {
    %c0_i32 = arith.constant 0 : i32
    %c0_i32_0 = arith.constant 0 : i32
    %c0_i32_1 = arith.constant 0 : i32
    return %c0_i32, %c0_i32_0 : i32, i32
  }
  func.func @transform_4(%arg0: i32) -> (i32, i32) {
    %c0_i32 = arith.constant 0 : i32
    %c0_i32_0 = arith.constant 0 : i32
    %c0_i32_1 = arith.constant 0 : i32
    return %c0_i32, %c0_i32_0 : i32, i32
  }
  func.func @transform_5(%arg0: i32) -> (i32, i32) {
    %c0_i32 = arith.constant 0 : i32
    %c0_i32_0 = arith.constant 0 : i32
    return %c0_i32, %arg0 : i32, i32
  }
}

</mosaic_0001>

<bundles_post_ra>
// kernel: conv_bn_relu.3
= control target key start
LH: loop header
LB: loop body
LE: loop exit
PB: predicated region body
PF: predicated region fallthrough
CT: control target
= control target key end

     0   :  { %v83_v0 = vmov 0   ;;  %s150_s1 = inlined_call_operand.vmem [shape: f32[1,8,1], index: 1, kind: input, shape index: {}]   ;;  %s151_s2 = inlined_call_operand.vmem [shape: f32[1,8,1], index: 2, kind: input, shape index: {}]   ;;  %s152_s3 = inlined_call_operand.vmem [shape: f32[8,1], index: 3, kind: input, shape index: {}]   ;;  %s153_s4 = inlined_call_operand.vmem [shape: f32[8,1], index: 4, kind: input, shape index: {}]   ;;  %s154_s0 = inlined_call_operand.vmem [shape: f32[8,512], index: 0, kind: input, shape index: {}, may-alias: {0,5}]   ;;  %s155_s5 = inlined_call_operand.vmem [shape: f32[8,512], index: 5, kind: output, shape index: {}, may-alias: {0,5}]  }
   0x1   :  { %80 = vset.pattern.permute.xlu0 %v83_v0  ;;  %v20_v1 = vld [vmem:[%s150_s1] sm:$0xff]  ;;  %v46_v23 = vld [vmem:[%s154_s0 + $0x8] sm:$0xff]  ;;  %v47_v24 = vld [vmem:[%s154_s0 + $0x10] sm:$0xff] }
   0x2   :  { %v22_v2 = vld [vmem:[%s151_s2] sm:$0xff]  ;;  %v24_v3 = vmul.f32 0.001953125, %v20_v1  ;;  %v48_v25 = vld [vmem:[%s154_s0 + $0x18] sm:$0xff] }
   0x3   :  { %v25_v4 = vmul.f32 0.001953125, %v22_v2  ;;  %v29_v14 = vld [vmem:[%s152_s3] sm:$0xff] }
   0x4   :  { %v26_v5 = vmul.f32 %v24_v3, %v24_v3  ;;  %v42_v19 = vld [vmem:[%s153_s4] sm:$0xff] }
   0x5   :  { %v45_v22 = vld [vmem:[%s154_s0] sm:$0xff] }
   0x6   :  { %v27_v6 = vsub.f32 %v25_v4, %v26_v5 }
   0x8   :  { %v28_v7 = vmax.f32 %v27_v6, 0.0 }
   0xa   :  { %v30_v8 = vadd.f32 1e-05, %v28_v7 }
   0xc   :  { %81 = vrsqrt.f32 %v30_v8  ;;  %vm37_vm0 = vweird.f32 %v30_v8 }
  0x12   :  { %v82_v9 = vpop.eup %81 }
  0x13   :  { %v32_v10 = vmul.f32 %v82_v9, %v30_v8  ;;  %vm38_vm1 = vweird.f32 %v82_v9 }
  0x14   :  { %vm39_vm2 = vmor %vm37_vm0, %vm38_vm1 }
  0x15   :  { %v33_v11 = vmul.f32 %v82_v9, %v32_v10 }
  0x17   :  { %v34_v12 = vmul.f32 0.5, %v33_v11 }
  0x19   :  { %v35_v13 = vsub.f32 1.5, %v34_v12 }
  0x1b   :  { %v36_v15 = vmul.f32 %v82_v9, %v35_v13 }
  0x1d   :  { %v40_v16 = vsel %vm39_vm2, %v82_v9, %v36_v15 }
  0x1e   :  { %v41_v17 = vmul.f32 %v40_v16, %v29_v14 }
  0x20   :  { %51 = vperm.xlu0 %80, %v41_v17   ;;  %v43_v18 = vmul.f32 %v41_v17, %v24_v3 }
  0x22   :  { %v44_v20 = vsub.f32 %v42_v19, %v43_v18 }
  0x28   :  { %60 = vperm.xlu0 %80, %v44_v20  }
  0x92   :  { %v52_v21 = vpop.permute.xlu0 %51 }
  0x93   :  { %v54_v26 = vmul.f32 %v52_v21, %v45_v22  ;;  %v55_v27 = vmul.f32 %v52_v21, %v46_v23  ;;  %v56_v28 = vmul.f32 %v52_v21, %v47_v24  ;;  %v57_v29 = vmul.f32 %v52_v21, %v48_v25 }
  0x9a   :  { %v61_v30 = vpop.permute.xlu0 %60 }
  0x9b   :  { %v63_v31 = vadd.f32 %v61_v30, %v54_v26  ;;  %v64_v32 = vadd.f32 %v61_v30, %v55_v27  ;;  %v65_v33 = vadd.f32 %v61_v30, %v56_v28  ;;  %v66_v34 = vadd.f32 %v61_v30, %v57_v29 }
  0x9d   :  { %v67_v35 = vmax.f32 %v63_v31, 0.0  ;;  %v68_v36 = vmax.f32 %v64_v32, 0.0  ;;  %v69_v37 = vmax.f32 %v65_v33, 0.0  ;;  %v70_v38 = vmax.f32 %v66_v34, 0.0 }
  0x9f   :  { %71 = vst [vmem:[%s155_s5] sm:$0xff] %v67_v35 }
  0xa0   :  { %72 = vst [vmem:[%s155_s5 + $0x8] sm:$0xff] %v68_v36 }
  0xa1   :  { %73 = vst [vmem:[%s155_s5 + $0x10] sm:$0xff] %v69_v37 }
  0xa2   :  { %74 = vst [vmem:[%s155_s5 + $0x18] sm:$0xff] %v70_v38 }

// kernel: conv_bn_relu.2
= control target key start
LH: loop header
LB: loop body
LE: loop exit
PB: predicated region body
PF: predicated region fallthrough
CT: control target
= control target key end

     0   :  { %vm39_vm0 = vcmask 1043456   ;;  %vm35_vm1 = vcmask 293888   ;;  %vm141_vm2 = vcmask 7168   ;;  %s279_s0 = inlined_call_operand.vmem [shape: f32[36,512], index: 0, kind: input, shape index: {}]   ;;  %s280_s1 = inlined_call_operand.vmem [shape: f32[8,36], index: 1, kind: input, shape index: {}]   ;;  %s281_s2 = inlined_call_operand.vmem [shape: f32[8,512], index: 2, kind: output, shape index: {0}]   ;;  %s282_s3 = inlined_call_operand.vmem [shape: f32[1,8,1], index: 3, kind: output, shape index: {1}]   ;;  %s283_s4 = inlined_call_operand.vmem [shape: f32[1,8,1], index: 4, kind: output, shape index: {2}]  }
   0x1   :  { %v33_v0 = vld [vmem:[%s279_s0 + $0x90] sm:$0xf]  ;;  %v34_v2 = vld [vmem:[%s279_s0 + $0x98] sm:$0xf]  ;;  %v31_v3 = vld [vmem:[%s279_s0 + $0x80] sm:$0xf] }
   0x2   :  { %v29_v1 = vld [vmem:[%s279_s0 + $0x70] sm:$0xff]  ;;  %169 = vmatpush.msk.msra.mxu2 %vm39_vm0, %v33_v0  ;;  %171 = vmatpush.msk.msra.mxu3 %vm39_vm0, %v34_v2  ;;  %v32_v4 = vld [vmem:[%s279_s0 + $0x88] sm:$0xf]  ;;  %v30_v6 = vld [vmem:[%s279_s0 + $0x78] sm:$0xff] }
   0x3   :  { %v25_v5 = vld [vmem:[%s279_s0 + $0x50] sm:$0xff]  ;;  %165 = vmatpush.msk.msra.mxu0 %vm39_vm0, %v31_v3  ;;  %167 = vmatpush.msk.msra.mxu1 %vm39_vm0, %v32_v4  ;;  %v27_v7 = vld [vmem:[%s279_s0 + $0x60] sm:$0xff]  ;;  %v28_v8 = vld [vmem:[%s279_s0 + $0x68] sm:$0xff] }
   0x4   :  { %104 = vmatpush.msra.mxu2 %v29_v1  ;;  %124 = vmatpush.msra.mxu3 %v30_v6  ;;  %v26_v9 = vld [vmem:[%s279_s0 + $0x58] sm:$0xff]  ;;  %v23_v10 = vld [vmem:[%s279_s0 + $0x40] sm:$0xff]  ;;  %v21_v11 = vld [vmem:[%s279_s0 + $0x30] sm:$0xff] }
   0x5   :  { %64 = vmatpush.msra.mxu0 %v27_v7  ;;  %84 = vmatpush.msra.mxu1 %v28_v8  ;;  %v24_v12 = vld [vmem:[%s279_s0 + $0x48] sm:$0xff]  ;;  %v22_v13 = vld [vmem:[%s279_s0 + $0x38] sm:$0xff]  ;;  %v19_v14 = vld [vmem:[%s279_s0 + $0x20] sm:$0xff] }
   0x6   :  { %105 = vmatpush.msra.mxu2 %v25_v5  ;;  %125 = vmatpush.msra.mxu3 %v26_v9  ;;  %v20_v15 = vld [vmem:[%s279_s0 + $0x28] sm:$0xff]  ;;  %v17_v16 = vld [vmem:[%s279_s0 + $0x10] sm:$0xff]  ;;  %v18_v17 = vld [vmem:[%s279_s0 + $0x18] sm:$0xff] }
   0x7   :  { %65 = vmatpush.msra.mxu0 %v23_v10  ;;  %85 = vmatpush.msra.mxu1 %v24_v12  ;;  %v14_v18 = vld [vmem:[%s280_s1] sm:$0xff]  ;;  %v16_v20 = vld [vmem:[%s279_s0 + $0x8] sm:$0xff] }
   0x8   :  { %106 = vmatpush.msra.mxu2 %v21_v11  ;;  %126 = vmatpush.msra.mxu3 %v22_v13  ;;  %v15_v19 = vld [vmem:[%s279_s0] sm:$0xff] }
   0x9   :  { %66 = vmatpush.msra.mxu0 %v19_v14  ;;  %86 = vmatpush.msra.mxu1 %v20_v15 }
   0xa   :  { %107 = vmatpush.msra.mxu2 %v17_v16  ;;  %127 = vmatpush.msra.mxu3 %v18_v17 }
   0xb   :  { %170 = vmatmul.msk.f32.vlgmr.msra.gmra.mxu2 %vm35_vm1, %v14_v18  ;;  %172 = vmatmul.msk.f32.vlgmr.msra.gmra.mxu3 %vm35_vm1, %v14_v18 }
   0xc   :  { %67 = vmatpush.msra.mxu0 %v15_v19  ;;  %87 = vmatpush.msra.mxu1 %v16_v20 }
   0xd   :  { %166 = vmatmul.msk.f32.vlgmr.msra.gmra.mxu0 %vm35_vm1, %v14_v18  ;;  %168 = vmatmul.msk.f32.vlgmr.msra.gmra.mxu1 %vm35_vm1, %v14_v18 }
  0x8a   :  { %v69_v21 = vpop.f32.mrf.mxu0  ;;  %v89_v22 = vpop.f32.mrf.mxu1 }
  0x8b   :  { %132 = vst [vmem:[%s281_s2] sm:$0xff] %v69_v21  ;;  %v136_v23 = vadd.f32 %v89_v22, %v69_v21  ;;  %v143_v24 = vmul.f32 %v69_v21, %v69_v21  ;;  %v144_v25 = vmul.f32 %v89_v22, %v89_v22 }
  0x8c   :  { %133 = vst [vmem:[%s281_s2 + $0x8] sm:$0xff] %v89_v22 }
  0x8d   :  { %v147_v29 = vadd.f32 %v144_v25, %v143_v24 }
  0x8e   :  { %v109_v26 = vpop.f32.mrf.mxu2  ;;  %v129_v27 = vpop.f32.mrf.mxu3 }
  0x8f   :  { %134 = vst [vmem:[%s281_s2 + $0x10] sm:$0xff] %v109_v26  ;;  %v137_v28 = vadd.f32 %v136_v23, %v109_v26  ;;  %v145_v30 = vmul.f32 %v109_v26, %v109_v26  ;;  %v146_v32 = vmul.f32 %v129_v27, %v129_v27 }
  0x90   :  { %135 = vst [vmem:[%s281_s2 + $0x18] sm:$0xff] %v129_v27 }
  0x91   :  { %v138_v31 = vadd.f32 %v137_v28, %v129_v27  ;;  %v148_v33 = vadd.f32 %v147_v29, %v145_v30 }
  0x93   :  { %139 = vadd.xlane.f32.xlu0 %v138_v31  ;;  %v149_v34 = vadd.f32 %v148_v33, %v146_v32 }
  0x9b   :  { %150 = vadd.xlane.f32.xlu0 %v149_v34 }
 0x106   :  { %v140_v35 = vpop.xlane.xlu0 %139 }
 0x107   :  { %142 = vst.msk [vmem:[%s282_s3] sm:$0xff] %vm141_vm2, %v140_v35 }
 0x10e   :  { %v151_v36 = vpop.xlane.xlu0 %150 }
 0x10f   :  { %152 = vst.msk [vmem:[%s283_s4] sm:$0xff] %vm141_vm2, %v151_v36 }

</bundles_post_ra>
